<compile_context>
chip_gen: v7x
topology: tpu7x:2x2x1
jax: 0.10.0
libtpu: 0.0.40
codegen_flags: <defaults>
</compile_context>

<pallas_src>
import functools
import math

import jax
import jax.numpy as jnp
from jax import lax
from jax.experimental import pallas as pl
from jax.experimental.pallas import tpu as pltpu

LANE = 128
SUBLANE = 8
_MIN_STEPS_PER_CHUNK = 4              # keep pipeline prologue/epilogue hidden
_KL_PALLAS_BYTE_LIMIT = 8 * 1024 * 1024   # whole-block cap per latent tensor


def _tpu_generation_config():
    """Per-generation tile size / VMEM budget / core-parallel choice."""
    try:
        kind = jax.devices()[0].device_kind.lower()
    except Exception:  # pragma: no cover - defensive
        kind = ""
    if "v7" in kind:
        # 64 MiB physical VMEM, ~3.2 TB/s HBM: bigger tiles, raised limit,
        # and split the row range across the 2 TensorCores.
        return dict(tile_bytes=6 * 1024 * 1024,
                    vmem_limit=48 * 1024 * 1024,
                    core_parallel=True)
    if "v6" in kind or "trillium" in kind:
        return dict(tile_bytes=4 * 1024 * 1024,
                    vmem_limit=48 * 1024 * 1024,
                    core_parallel=False)
    if "v5 lite" in kind or "v5e" in kind or "v5lite" in kind:
        # Default scoped VMEM is only 16 MiB on v5e: raise it explicitly.
        return dict(tile_bytes=3 * 1024 * 1024,
                    vmem_limit=32 * 1024 * 1024,
                    core_parallel=False)
    return dict(tile_bytes=4 * 1024 * 1024,
                vmem_limit=40 * 1024 * 1024,
                core_parallel=False)


def _sse_kernel(x_ref, r_ref, out_ref, *, inner_rows, steps, tile_rows,
                rows, ragged, unroll):
    """Accumulate sum((x - r)^2) for this chunk into a (1, 8, 128) f32 block."""
    c = pl.program_id(0)
    i = pl.program_id(1)

    @pl.when(i == 0)
    def _():
        out_ref[...] = jnp.zeros_like(out_ref)

    row0 = (c * steps + i) * tile_rows        # first (unclamped) global row
    n_inner = tile_rows // inner_rows         # static

    def tile_sse(mask_rows):
        def body(j, acc):
            off = pl.multiple_of(j * inner_rows, inner_rows)
            d = (x_ref[pl.ds(off, inner_rows), :].astype(jnp.float32)
                 - r_ref[pl.ds(off, inner_rows), :].astype(jnp.float32))
            if mask_rows:
                rid = row0 + off + lax.broadcasted_iota(
                    jnp.int32, (inner_rows, 1), 0)
                d = jnp.where(rid < rows, d, 0.0)
            sq = d * d
            # Vreg-shaped accumulation: the reshape groups sublanes (layout
            # no-op) and the leading-axis sum is pure VPU adds -- no XLU
            # cross-lane reduce, no VMEM RMW in the hot loop.
            return acc + jnp.sum(sq.reshape(-1, SUBLANE, LANE), axis=0)

        return lax.fori_loop(0, n_inner, body,
                             jnp.zeros((SUBLANE, LANE), jnp.float32),
                             unroll=unroll)

    if ragged:
        # Only the last real tile (and any dummy tile of an uneven 2-chunk
        # split) pays the row-masking cost.
        acc = lax.cond(row0 + tile_rows <= rows,
                       lambda: tile_sse(False),
                       lambda: tile_sse(True))
    else:
        acc = tile_sse(False)

    out_ref[...] += acc[None]


def _reconstruction_sse(x, x_reconstructed):
    """sum((x_reconstructed - x)^2) in f32, streamed via a Pallas kernel."""
    assert x.shape == x_reconstructed.shape
    total = math.prod(x.shape)
    itemsize = jnp.dtype(x.dtype).itemsize
    packing = max(1, 4 // itemsize)           # 1 f32, 2 bf16, 4 int8/fp8
    min_rows = SUBLANE * packing              # dtype-aware minimal sublane block

    xf = x.reshape(-1)
    rf = x_reconstructed.reshape(-1)

    rows = total // LANE
    if rows < min_rows:
        # Smaller than one TPU tile: not worth a kernel launch.
        d = xf.astype(jnp.float32) - rf.astype(jnp.float32)
        return jnp.sum(d * d)

    sse_tail = None
    main = rows * LANE
    if main == total:
        x2 = xf.reshape(rows, LANE)           # pure metadata reshape, no copy
        r2 = rf.reshape(rows, LANE)
    else:
        # TODO(synk): lane-ragged flat sizes (total % 128 != 0) still pay one
        # HBM copy for the prefix slice; rare for image tensors.
        x2 = xf[:main].reshape(rows, LANE)
        r2 = rf[:main].reshape(rows, LANE)
        dt = xf[main:].astype(jnp.float32) - rf[main:].astype(jnp.float32)
        sse_tail = jnp.sum(dt * dt)

    cfg = _tpu_generation_config()

    # --- Tiling -------------------------------------------------------------
    num_chunks = 2 if rows >= 2 * min_rows else 1
    target_rows = max(min_rows,
                      (cfg["tile_bytes"] // (LANE * itemsize))
                      // min_rows * min_rows)
    # Cap tile growth so each chunk keeps >= _MIN_STEPS_PER_CHUNK grid steps.
    cap_rows = rows // (num_chunks * _MIN_STEPS_PER_CHUNK)
    cap_rows = max(min_rows, cap_rows // min_rows * min_rows)
    cand = min(target_rows, cap_rows)
    # 64-row inner blocks keep vreg pressure low under unrolling.
    inner_rows = min(8 * SUBLANE, cand)
    tile_rows = max(inner_rows, cand // inner_rows * inner_rows)

    total_tiles = -(-rows // tile_rows)
    if total_tiles < 2:
        num_chunks = 1
    steps = -(-total_tiles // num_chunks)
    has_dummy = num_chunks * steps > total_tiles
    ragged = has_dummy or (total_tiles * tile_rows != rows)

    n_inner = tile_rows // inner_rows
    if n_inner <= 4:
        unroll = True
    elif n_inner % 2 == 0:
        unroll = 2
    else:
        unroll = 1

    if has_dummy:
        # Clamp so dummy trailing steps re-read (and fully mask) the last tile.
        def in_map(c, i):
            return (jnp.minimum(c * steps + i, total_tiles - 1), 0)
    else:
        def in_map(c, i):
            return (c * steps + i, 0)

    if cfg["core_parallel"] and num_chunks == 2:
        dim_sem = (pltpu.CORE_PARALLEL, pltpu.ARBITRARY)
    else:
        dim_sem = ("parallel", "arbitrary")

    kernel = functools.partial(
        _sse_kernel, inner_rows=inner_rows, steps=steps, tile_rows=tile_rows,
        rows=rows, ragged=ragged, unroll=unroll)

    partials = pl.pallas_call(
        kernel,
        out_shape=jax.ShapeDtypeStruct((num_chunks, SUBLANE, LANE),
                                       jnp.float32),
        grid_spec=pltpu.PrefetchScalarGridSpec(
            num_scalar_prefetch=0,
            grid=(num_chunks, steps),
            in_specs=[
                pl.BlockSpec((tile_rows, LANE), in_map),
                pl.BlockSpec((tile_rows, LANE), in_map),
            ],
            out_specs=pl.BlockSpec((1, SUBLANE, LANE), lambda c, i: (c, 0, 0)),
        ),
        compiler_params=pltpu.CompilerParams(
            dimension_semantics=dim_sem,
            vmem_limit_bytes=cfg["vmem_limit"],
        ),
        cost_estimate=pl.CostEstimate(
            flops=3 * main,
            transcendentals=0,
            bytes_accessed=2 * main * itemsize
            + num_chunks * SUBLANE * LANE * 4,
        ),
    )(x2, r2)

    sse = jnp.sum(partials)
    if sse_tail is not None:
        sse = sse + sse_tail
    return sse


def _kl_kernel(m_ref, ls_ref, s_ref, out_ref, *, scale):
    m = m_ref[...].astype(jnp.float32)
    ls = ls_ref[...].astype(jnp.float32)
    s = s_ref[...].astype(jnp.float32)
    v = m * m + s * s - 2.0 * ls - 1.0
    out_ref[...] = jnp.sum(v, keepdims=True) * jnp.float32(scale)


def _kl_loss(z_mean, z_log_sigma, z_sigma, batch_size):
    assert z_mean.shape == z_log_sigma.shape == z_sigma.shape
    m2 = z_mean.reshape(batch_size, -1)
    ls2 = z_log_sigma.reshape(batch_size, -1)
    s2 = z_sigma.reshape(batch_size, -1)
    per_tensor_bytes = m2.size * jnp.dtype(m2.dtype).itemsize
    if per_tensor_bytes > _KL_PALLAS_BYTE_LIMIT:
        # TODO(synk): tile the KL reduction like the recon kernel if latent
        # tensors ever exceed a few MiB; fused plain XLA is used meanwhile.
        v = (m2.astype(jnp.float32) ** 2 + s2.astype(jnp.float32) ** 2
             - 2.0 * ls2.astype(jnp.float32) - 1.0)
        return 0.5 * jnp.sum(v) / batch_size
    out = pl.pallas_call(
        functools.partial(_kl_kernel, scale=0.5 / batch_size),
        out_shape=jax.ShapeDtypeStruct((1, 1), jnp.float32),
    )(m2, ls2, s2)
    return out[0, 0]


def vae_criterion(x, x_reconstructed, z_mean, z_log_sigma, z_sigma,
                  x_sigma=1.0):
    """Returns (reconstruct_loss, kl_loss), matching VAECriterion.forward."""
    batch_size = x.shape[0]
    sse = _reconstruction_sse(x, x_reconstructed)
    # Apply x_sigma with jnp ops so a traced / learned x_sigma works under jit.
    x_sigma_f = jnp.asarray(x_sigma, jnp.float32)
    recon = 0.5 * sse / (x_sigma_f * x_sigma_f * batch_size)
    kl = _kl_loss(z_mean, z_log_sigma, z_sigma, batch_size)
    return recon, kl


def vae_criterion_ref(x, x_reconstructed, z_mean, z_log_sigma, z_sigma,
                      x_sigma=1.0):
    b = x.shape[0]
    d = x_reconstructed.astype(jnp.float32) - x.astype(jnp.float32)
    recon = 0.5 * jnp.sum(d * d) / (jnp.asarray(x_sigma, jnp.float32) ** 2 * b)
    kl = 0.5 * jnp.sum(z_mean.astype(jnp.float32) ** 2
                       + z_sigma.astype(jnp.float32) ** 2
                       - 2.0 * z_log_sigma.astype(jnp.float32) - 1.0) / b
    return recon, kl


if __name__ == "__main__":
    key = jax.random.PRNGKey(0)
    k1, k2, k3, k4 = jax.random.split(key, 4)
    B, C, H, W = 2, 4, 16, 16
    Z = 32
    x = jax.random.normal(k1, (B, C, H, W), dtype=jnp.float32)
    x_reconstructed = jax.random.normal(k2, (B, C, H, W), dtype=jnp.float32)
    z_mean = jax.random.normal(k3, (B, Z), dtype=jnp.float32)
    z_log_sigma = 0.1 * jax.random.normal(k4, (B, Z), dtype=jnp.float32)
    z_sigma = jnp.exp(z_log_sigma)

    recon, kl = vae_criterion(x, x_reconstructed, z_mean, z_log_sigma, z_sigma,
                              x_sigma=1.0)
    recon = jax.block_until_ready(recon)
    kl = jax.block_until_ready(kl)

    recon_ref, kl_ref = vae_criterion_ref(x, x_reconstructed, z_mean,
                                          z_log_sigma, z_sigma, x_sigma=1.0)
    assert jnp.allclose(recon, recon_ref, rtol=1e-5, atol=1e-5), (recon, recon_ref)
    assert jnp.allclose(kl, kl_ref, rtol=1e-5, atol=1e-5), (kl, kl_ref)

    # A shape with an odd / ragged tile count: exercises the in-kernel
    # row-masking + dummy-tile path (no materialized prefix copy).
    k5, k6 = jax.random.split(k1)
    xb = jax.random.normal(k5, (2, 3, 24, 16), dtype=jnp.float32)
    rb = jax.random.normal(k6, (2, 3, 24, 16), dtype=jnp.float32)
    recon_b, _ = vae_criterion(xb, rb, z_mean, z_log_sigma, z_sigma)
    recon_b = jax.block_until_ready(recon_b)
    recon_b_ref, _ = vae_criterion_ref(xb, rb, z_mean, z_log_sigma, z_sigma)
    assert jnp.allclose(recon_b, recon_b_ref, rtol=1e-5, atol=1e-5), (
        recon_b, recon_b_ref)

    print("KERNEL_OK")
</pallas_src>

<mosaic_0001>
module attributes {stable_mosaic.version = 11 : i64} {
  func.func @_sse_kernel(%arg0: i32, %arg1: i32, %arg2: memref<8x128xf32, #tpu.memory_space<vmem>>, %arg3: memref<8x128xf32, #tpu.memory_space<vmem>>, %arg4: memref<1x8x128xf32, #tpu.memory_space<vmem>>) attributes {dimension_semantics = [#tpu.dimension_semantics<parallel>, #tpu.dimension_semantics<arbitrary>], iteration_bounds = array<i64: 2, 1>, scalar_prefetch = 0 : i64, scratch_operands = 0 : i64, tpu.core_type = #tpu.core_type<tc>, window_params = [{transform_indices = @transform_0, window_bounds = array<i64: 8, 128>}, {transform_indices = @transform_1, window_bounds = array<i64: 8, 128>}, {transform_indices = @transform_2, window_bounds = array<i64: 1, 8, 128>}]} {
    %c0_i32 = arith.constant 0 : i32
    %0 = arith.cmpi eq, %arg1, %c0_i32 : i32
    %1 = arith.extui %0 : i1 to i32
    %c0_i32_0 = arith.constant 0 : i32
    %2 = arith.cmpi ne, %1, %c0_i32_0 : i32
    scf.if %2 {
      %cst_10 = arith.constant 0.000000e+00 : f32
      %19 = vector.broadcast %cst_10 : f32 to vector<1x8x128xf32>
      %c0_11 = arith.constant 0 : index
      %c0_12 = arith.constant 0 : index
      %c0_13 = arith.constant 0 : index
      %20 = vector.load %arg4[%c0_11, %c0_12, %c0_13] : memref<1x8x128xf32, #tpu.memory_space<vmem>>, vector<1x8x128xf32>
      tpu.vector_store %arg4[%c0_11, %c0_12, %c0_13], %19 {strides = array<i32>} : memref<1x8x128xf32, #tpu.memory_space<vmem>>, vector<1x8x128xf32>,
    } else {
    }
    %cst = arith.constant 0.000000e+00 : f32
    %3 = vector.broadcast %cst : f32 to vector<8x128xf32>
    %c0_i32_1 = arith.constant 0 : i32
    %c8_i32 = arith.constant 8 : i32
    %4 = arith.muli %c0_i32_1, %c8_i32 : i32
    %5 = tpu.assume_multiple %4, 8 : i32
    %6 = arith.index_cast %5 : i32 to index
    %c0 = arith.constant 0 : index
    %7 = vector.load %arg2[%6, %c0] : memref<8x128xf32, #tpu.memory_space<vmem>>, vector<8x128xf32>
    %8 = arith.index_cast %5 : i32 to index
    %c0_2 = arith.constant 0 : index
    %9 = vector.load %arg3[%8, %c0_2] : memref<8x128xf32, #tpu.memory_space<vmem>>, vector<8x128xf32>
    %10 = arith.subf %7, %9 : vector<8x128xf32>
    %11 = arith.mulf %10, %10 : vector<8x128xf32>
    %12 = vector.shape_cast %11 : vector<8x128xf32> to vector<1x8x128xf32>
    %cst_3 = arith.constant dense<0.000000e+00> : vector<8x128xf32>
    %13 = vector.multi_reduction <add>, %12, %cst_3 [0] : vector<1x8x128xf32> to vector<8x128xf32>
    %14 = arith.addf %3, %13 : vector<8x128xf32>
    %c1_i32 = arith.constant 1 : i32
    %c0_4 = arith.constant 0 : index
    %c0_5 = arith.constant 0 : index
    %c0_6 = arith.constant 0 : index
    %15 = vector.load %arg4[%c0_4, %c0_5, %c0_6] : memref<1x8x128xf32, #tpu.memory_space<vmem>>, vector<1x8x128xf32>
    %16 = vector.shape_cast %14 : vector<8x128xf32> to vector<1x8x128xf32>
    %17 = arith.addf %15, %16 : vector<1x8x128xf32>
    %c0_7 = arith.constant 0 : index
    %c0_8 = arith.constant 0 : index
    %c0_9 = arith.constant 0 : index
    %18 = vector.load %arg4[%c0_7, %c0_8, %c0_9] : memref<1x8x128xf32, #tpu.memory_space<vmem>>, vector<1x8x128xf32>
    tpu.vector_store %arg4[%c0_7, %c0_8, %c0_9], %17 {strides = array<i32>} : memref<1x8x128xf32, #tpu.memory_space<vmem>>, vector<1x8x128xf32>,
    return
  }
  func.func @transform_0(%arg0: i32, %arg1: i32) -> (i32, i32) {
    %c1_i32 = arith.constant 1 : i32
    %0 = arith.muli %arg0, %c1_i32 : i32
    %1 = arith.addi %0, %arg1 : i32
    %c0_i32 = arith.constant 0 : i32
    %c0_i32_0 = arith.constant 0 : i32
    return %1, %c0_i32 : i32, i32
  }
  func.func @transform_1(%arg0: i32, %arg1: i32) -> (i32, i32) {
    %c1_i32 = arith.constant 1 : i32
    %0 = arith.muli %arg0, %c1_i32 : i32
    %1 = arith.addi %0, %arg1 : i32
    %c0_i32 = arith.constant 0 : i32
    %c0_i32_0 = arith.constant 0 : i32
    return %1, %c0_i32 : i32, i32
  }
  func.func @transform_2(%arg0: i32, %arg1: i32) -> (i32, i32, i32) {
    %c0_i32 = arith.constant 0 : i32
    %c0_i32_0 = arith.constant 0 : i32
    %c0_i32_1 = arith.constant 0 : i32
    return %arg0, %c0_i32, %c0_i32_0 : i32, i32, i32
  }
}

</mosaic_0001>

<bundles_post_ra>
// kernel: tpu_custom_call.1
= control target key start
LH: loop header
LB: loop body
LE: loop exit
PB: predicated region body
PF: predicated region fallthrough
CT: control target
= control target key end

     0   :  { %7 = vsyncpa [#allocation3], 0  ;;  %s817_s0 = inlined_call_operand.hbm [shape: f32[16,128], index: 0, kind: input, shape index: {}]   ;;  %s818_s1 = inlined_call_operand.hbm [shape: f32[16,128], index: 1, kind: input, shape index: {}]   ;;  %s819_s2 = inlined_call_operand.hbm [shape: f32[2,8,128], index: 2, kind: output, shape index: {}]  }
   0x1   :  { %9 = vsyncpa [#allocation3 + $0x1], 0 }
   0x2   :  { %10 = vsyncpa [#allocation6], 0 }
   0x3   :  { %12 = vsyncpa [#allocation6 + $0x1], 0 }
   0x4   :  { %13 = vsyncpa [#allocation4], 0 }
   0x5   :  { %15 = vsyncpa [#allocation4 + $0x1], 0  ;;  %s597_s9 = smov 0   ;;  %s599_s10 = smov 0  }
   0x6   :  { %s601_s11 = smov 0   ;;  %s603_s12 = smov 0  }
   0x7   :  { %s605_s13 = smov 0   ;;  %s607_s14 = smov 0  }
   0x8 LB: > { %s347_s15 = sadd.s32 4294967295, %s577_s14   ;;  %s348_s16 = sadd.s32 4294967294, %s577_s14   ;;  %s577_s14 = sphi %s607_s14, %s21_s14   ;;  %s573_s13 = sphi %s605_s13, %s839_s13   ;;  %s569_s12 = sphi %s603_s12, %s838_s12   ;;  %s565_s11 = sphi %s601_s11, %s837_s11   ;;  %s561_s10 = sphi %s599_s10, %s836_s10   ;;  %s557_s9 = sphi %s597_s9, %s835_s9  }
   0x9   : > { %s33_s17 = sadd.s32 1, %s573_s13  ;;  %s42_s18 = sadd.s32 1, %s565_s11 }
   0xa   : > { %p35_p0 = scmp.ge.s32.totalorder %s33_s17, 2  ;;  %p49_p1 = scmp.ne.s32.totalorder %s565_s11, %s561_s10 }
   0xb   : > { %p50_p2 = scmp.eq.s32.totalorder %s577_s14, 0  ;;  %p55_p3 = scmp.ne.s32.totalorder %s561_s10, %s557_s9 }
   0xc   : > { %s841_s17 = smov (%p35_p0, %s33_s17), 0  ;;  %p56_p5 = scmp.eq.s32.totalorder %s347_s15, 0 }
   0xd   : > { %p638_p4 = por %p50_p2, %p49_p1  ;;  %s39_s20 = ssub.s32 %s573_s13, %s841_s17 }
   0xe   : > { %p107_p6 = scmp.eq.s32.totalorder %s347_s15, 1  ;;  %p40_p7 = scmp.eq.s32.totalorder %s39_s20, 0 }
   0xf   : > { %p644_p8 = por %p56_p5, %p55_p3  ;;  %p113_p10 = scmp.eq.s32.totalorder %s348_s16, 1 }
  0x10   : > { %p648_p9 = por %p107_p6, %p49_p1  ;;  %p380_p13 = scmp.lt.s32.totalorder %s577_s14, 2 }
  0x11   : > { %s823_s21 = scalar_select %p644_p8, 1, 0 }
  0x12   : > { %s824_s22 = scalar_select %p648_p9, 1, 0 }
  0x13   : > { %s653_s23 = scalar_select %p40_p7, %s565_s11, %s42_s18  }
  0x14   : > { %p655_p11 = por %p113_p10, %p55_p3  ;;  %s662_s25 = sand.u32 1, %s565_s11  }
  0x15   : > { %s351_s26 = sshll.u32 %s662_s25, 3  ;;  %s352_s27 = sshll.u32 %s573_s13, 7 }
  0x16   : > { %s825_s24 = scalar_select %p655_p11, 1, 0 }
  0x17   : > { %s671_s30 = scalar_lea.hbm %s817_s0, %s352_s27  ;;  %s137_s3 = scalar_lea.vmem [#allocation2], %s351_s26 }
  0x18   : > { %s145_s4 = sshll.u32 %s137_s3, 4  ;;  %p679_p0 = pnand %p380_p13, %p638_p4  ;;  %s675_s4 = int_to_ptr.vmem [resolvable:$true] %s145_s4 }
  0x19   : > { %s134_s6 = scalar_lea.sflag [#allocation3], %s662_s25  ;;  %s431_s7 = scalar_lea.hbm %s671_s30, 128 }
  0x1a   : > { %p432_p3 = scmp.ne.s32.totalorder %s671_s30, %s431_s7  ;;  %p433_p5 = pneg %p679_p0 }
  0x1b   : > { %s436_s16 = scalar_lea.hbm %s817_s0, 256  ;;  %p437_p4 = scmp.lt.u32.totalorder %s671_s30, %s817_s0 }
  0x1c   : > { %p434_p6 = pnand %p433_p5, %p432_p3  ;;  %p438_p10 = scmp.lt.u32.totalorder %s436_s16, %s431_s7 }
  0x1d   : > { %p440_p12 = scmp.lt.u32.totalorder %s431_s7, %s671_s30 }
  0x1e   : > { %p435_p7 = pneg %p434_p6  ;;  %p439_p13 = por %p438_p10, %p437_p4 }
  0x20   : > { %p441_p1 = por %p440_p12, %p439_p13 }
  0x22   : > { %p442_p2 = pnand %p441_p1, %p435_p7 }
  0x24   : > { %445 = shalt.err (!%p442_p2)
}
  0x25   : > { %s446_s20 = scalar_lea.vmem %s675_s4, 128  ;;  %s579_s28 = smov [#allocation2]  }
  0x26   : > { %p447_p3 = scmp.ne.s32.totalorder %s675_s4, %s446_s20  ;;  %s451_s29 = sshll.u32 %s579_s28, 4  ;;  %s452_s29 = int_to_ptr.vmem [resolvable:$false] %s451_s29 }
  0x27   : > { %s453_s3 = scalar_lea.vmem %s452_s29, 256  ;;  %p454_p9 = scmp.lt.s32.totalorder %s675_s4, %s452_s29 }
  0x28   : > { %p449_p6 = pnand %p447_p3, %p433_p5  ;;  %p455_p4 = scmp.lt.s32.totalorder %s453_s3, %s446_s20 }
  0x2a   : > { %p450_p11 = pneg %p449_p6  ;;  %p456_p10 = por %p455_p4, %p454_p9 }
  0x2c   : > { %p457_p12 = pnand %p456_p10, %p450_p11 }
  0x2e   : > { %460 = shalt.err (!%p457_p12)
}
  0x2f   : > { %372 = dma.hbm_to_vmem [thread:$0]  (!%p679_p0), %s671_s30, 128, %s675_s4, %s134_s6  }
  0x30   : > { %p827_p1 = scmp.lt.s32.totalorder %s577_s14, 3  ;;  %p828_p2 = scmp.ge.s32.totalorder %s577_s14, 1 }
  0x31   : > { %s724_s16 = scalar_lea.hbm %s818_s1, %s352_s27  ;;  %s156_s18 = scalar_lea.vmem [#allocation5], %s351_s26 }
  0x32   : > { %p715_p7 = pnand %p828_p2, %p827_p1  ;;  %s164_s19 = sshll.u32 %s156_s18, 4  ;;  %s165_s19 = int_to_ptr.vmem [resolvable:$true] %s164_s19 }
  0x33   : > { %s153_s30 = scalar_lea.sflag [#allocation6], %s662_s25  ;;  %s461_s4 = scalar_lea.hbm %s724_s16, 128 }
  0x34   : > { %s829_s7 = scalar_select %p715_p7, 1, 0 }
  0x35   : > { %p462_p9 = scmp.ne.s32.totalorder %s724_s16, %s461_s4  ;;  %s466_s27 = scalar_lea.hbm %s818_s1, 256 }
  0x36   : > { %p467_p3 = scmp.lt.u32.totalorder %s724_s16, %s818_s1  ;;  %p468_p6 = scmp.lt.u32.totalorder %s466_s27, %s461_s4 }
  0x37   : > { %p464_p11 = pnand %p462_p9, %p433_p5  ;;  %p470_p10 = scmp.lt.u32.totalorder %s461_s4, %s724_s16 }
  0x38   : > { %p469_p4 = por %p468_p6, %p467_p3 }
  0x39   : > { %p465_p13 = pneg %p464_p11 }
  0x3a   : > { %p471_p12 = por %p470_p10, %p469_p4 }
  0x3c   : > { %p472_p1 = pnand %p471_p12, %p465_p13 }
  0x3e   : > { %475 = shalt.err (!%p472_p1)
}
  0x3f   : > { %s476_s25 = scalar_lea.vmem %s165_s19, 128  ;;  %s580_s26 = smov [#allocation5]  }
  0x40   : > { %p477_p2 = scmp.ne.s32.totalorder %s165_s19, %s476_s25  ;;  %s481_s3 = sshll.u32 %s580_s26, 4  ;;  %s482_s3 = int_to_ptr.vmem [resolvable:$false] %s481_s3 }
  0x41   : > { %s483_s8 = scalar_lea.vmem %s482_s3, 256  ;;  %p484_p8 = scmp.lt.s32.totalorder %s165_s19, %s482_s3 }
  0x42   : > { %p479_p9 = pnand %p477_p2, %p433_p5  ;;  %p485_p7 = scmp.lt.s32.totalorder %s483_s8, %s476_s25 }
  0x44   : > { %p480_p11 = pneg %p479_p9  ;;  %p486_p3 = por %p485_p7, %p484_p8 }
  0x46   : > { %p487_p6 = pnand %p486_p3, %p480_p11 }
  0x48   : > { %490 = shalt.err (!%p487_p6)
}
  0x49   : > { %375 = dma.hbm_to_vmem [thread:$0]  (!%p679_p0), %s724_s16, 128, %s165_s19, %s153_s30  }
  0x4a   : > { %p830_p13 = scmp.ne.s32.totalorder %s829_s7, 0 }
  0x4b   : > { %s751_s15 = sand.u32 (!%p830_p13), 1, %s561_s10   ;;  %p831_p5 = scmp.ne.s32.totalorder (!%p830_p13), %s823_s21, 0 }
  0x4c   : > { %173 = sbr.rel (%p830_p13) target bundleno = 112 (0x70), region = 28  ;;  %s356_s18 = sshll.u32 (!%p830_p13), %s751_s15, 3 }
  0x4d   : > { %s176_s4 = scalar_lea.sflag (!%p830_p13), [#allocation3], %s751_s15  ;;  %s179_s6 = scalar_lea.vmem (!%p830_p13), [#allocation2], %s356_s18 }
  0x53   : > { %544 = dma.done.wait (%p831_p5), %s176_s4, 128  }
  0x54   : > { %546 = vsyncadd (%p831_p5), %s176_s4, 4294967168  ;;  %s185_s5 = scalar_lea.sflag [#allocation6], %s751_s15  ;;  %s188_s16 = scalar_lea.vmem [#allocation5], %s356_s18 }
  0x55   : > { %548 = dma.done.wait (%p831_p5), %s185_s5, 128  }
  0x56   : > { %550 = vsyncadd (%p831_p5), %s185_s5, 4294967168  ;;  %v221_v0 = vld [vmem:[%s179_s6] sm:$0xff]  ;;  %v222_v1 = vld [vmem:[%s188_s16] sm:$0xff]  ;;  %s360_s7 = sshll.u32 %s569_s12, 7  ;;  %s213_s19 = scalar_lea.vmem [#allocation7], %s356_s18 }
  0x57   : > { %v223_v2 = vsub.f32 %v221_v0, %v222_v1  ;;  %s244_s30 = sshll.u32 %s213_s19, 4  ;;  %s768_s28 = scalar_lea.hbm %s819_s2, %s360_s7  ;;  %s770_s30 = int_to_ptr.vmem [resolvable:$true] %s244_s30 }
  0x58   : > { %s231_s21 = scalar_lea.sflag [#allocation4], %s751_s15  ;;  %s491_s29 = scalar_lea.vmem %s770_s30, 128 }
  0x59   : > { %v224_v3 = vmul.f32 %v223_v2, %v223_v2  ;;  %p492_p8 = scmp.ne.s32.totalorder %s770_s30, %s491_s29  ;;  %p832_p0 = scmp.ne.s32.totalorder %s824_s22, 0 }
  0x5a   : > { %s581_s12 = smov [#allocation7]  }
  0x5b   : > { %229 = vst [vmem:[%s213_s19] sm:$0xff] %v224_v3  ;;  %p493_p7 = pnand %p492_p8, %p832_p0  ;;  %s495_s25 = sshll.u32 %s581_s12, 4  ;;  %s496_s25 = int_to_ptr.vmem [resolvable:$false] %s495_s25 }
  0x5c   : > { %s497_s26 = scalar_lea.vmem %s496_s25, 256  ;;  %p498_p10 = scmp.lt.s32.totalorder %s770_s30, %s496_s25 }
  0x5d   : > { %p494_p4 = pneg %p493_p7  ;;  %p499_p12 = scmp.lt.s32.totalorder %s497_s26, %s491_s29 }
  0x5f   : > { %p500_p1 = por %p499_p12, %p498_p10 }
  0x61   : > { %p501_p2 = pnand %p500_p1, %p494_p4 }
  0x63   : > { %504 = shalt.err (!%p501_p2)
}
  0x64   : > { %s505_s3 = scalar_lea.hbm %s768_s28, 128  ;;  %s509_s18 = scalar_lea.hbm %s819_s2, 256 }
  0x65   : > { %p506_p9 = scmp.ne.s32.totalorder %s768_s28, %s505_s3  ;;  %p510_p6 = scmp.lt.u32.totalorder %s768_s28, %s819_s2 }
  0x66   : > { %p511_p13 = scmp.lt.u32.totalorder %s509_s18, %s505_s3  ;;  %p513_p8 = scmp.lt.u32.totalorder %s505_s3, %s768_s28 }
  0x67   : > { %p507_p11 = pnand %p506_p9, %p832_p0 }
  0x68   : > { %p512_p5 = por %p511_p13, %p510_p6 }
  0x69   : > { %p508_p3 = pneg %p507_p11 }
  0x6a   : > { %p514_p7 = por %p513_p8, %p512_p5 }
  0x6c   : > { %p515_p4 = pnand %p514_p7, %p508_p3 }
  0x6e   : > { %518 = shalt.err (!%p515_p4)
}
  0x6f   : > { %367 = dma.vmem_to_hbm [thread:$0]  (%p832_p0), %s770_s30, 128, %s768_s28, %s231_s21  }
  0x70 PF: > { %s256_s5 = sand.u32 1, %s557_s9   ;;  %p833_p10 = scmp.ne.s32.totalorder %s825_s24, 0 }
  0x71   : > { %p834_p12 = scmp.ge.s32.totalorder %s577_s14, 2  ;;  %s257_s16 = scalar_lea.sflag [#allocation4], %s256_s5 }
  0x73   : > { %p377_p1 = pnand %p834_p12, %p833_p10 }
  0x75   : > { %552 = dma.done.wait (!%p377_p1), %s257_s16, 128  }
  0x76   : > { %554 = vsyncadd (!%p377_p1), %s257_s16, 4294967168  ;;  %s21_s14 = sadd.s32 1, %s577_s14   ;;  %s835_s9 = smov %s561_s10 }
  0x77   : > { %p18_p2 = scmp.ge.s32.totalorder %s21_s14, 4   ;;  %s836_s10 = smov %s565_s11 }
  0x78   : > { %s837_s11 = smov %s653_s23  ;;  %s838_s12 = smov %s573_s13 }
  0x79   : > { %s839_s13 = smov %s841_s17  ;;  %20 = sbr.rel (!%p18_p2) target bundleno = 8 (0x8), region = 90 }
  0x80   :  { %262 = vsyncpa [#allocation3], 1 }
  0x81   :  { %264 = vsyncpa [#allocation3 + $0x1], 1 }
  0x82   :  { %265 = vsyncpa [#allocation6], 1 }
  0x83   :  { %267 = vsyncpa [#allocation6 + $0x1], 1 }
  0x84   :  { %268 = vsyncpa [#allocation4], 1 }
  0x85   :  { %270 = vsyncpa [#allocation4 + $0x1], 1 }

</bundles_post_ra>
